<compile_context>
chip_gen: v6e
topology: v6e:2x2x1
jax: 0.10.0
libtpu: 0.0.40
codegen_flags: <defaults>
</compile_context>

<pallas_src>
import jax
import jax.numpy as jnp
from jax.experimental import pallas as pl
from jax.experimental.pallas import tpu as pltpu


def _decoder_matmul_kernel(y_ref, a_ref, o_ref):
    # One row tile: (TM, KK) @ (KK, HH) -> (TM, HH), f32 accumulation on the MXU.
    o_ref[...] = jnp.dot(
        y_ref[...], a_ref[...], preferred_element_type=jnp.float32
    ).astype(o_ref.dtype)


def _round_up(x, m):
    return ((x + m - 1) // m) * m


def decoder_forward(y_w, A, code_book_len, cluster_num, *,
                    block_rows=16384, min_pallas_rows=4096, out_dtype=None):
    """JAX/Pallas equivalent of Decoder.forward.

    y_w: any shape whose trailing elements flatten to K = code_book_len * cluster_num
         per row (PyTorch does y_w.reshape(-1, K)).
    A:   (K, hidden_dim) codebook matrix.

    block_rows:       logical-row tile size (amortizes per-grid-step overhead).
    min_pallas_rows:  below this row count, use a plain XLA dot (launch overhead
                      dominates for tiny batches).
    out_dtype:        dtype of E_hat (defaults to y_w's dtype).
    """
    K = code_book_len * cluster_num
    y = y_w.reshape(-1, K)                    # glue reshape, plain JAX
    M = y.shape[0]
    H = A.shape[1]
    if out_dtype is None:
        out_dtype = y.dtype

    # ---- Small-M fast path: XLA dot, no Pallas launch. ----
    if M < min_pallas_rows:
        return jnp.dot(y, A, preferred_element_type=jnp.float32).astype(out_dtype)

    # ---- Lane-dense packing factor: pack rows so the lane dim is 128. ----
    pack = (128 // K) if (K < 128 and 128 % K == 0) else 1

    if pack > 1:
        m_pad = _round_up(M, 8 * pack)        # packed row count multiple of 8
        if m_pad != M:
            # TODO(synk): avoid this <= (8*pack - 1)-row pad copy by handling the
            # tail rows with a separate tiny jnp.dot.
            y = jnp.pad(y, ((0, m_pad - M), (0, 0)))
        mp = m_pad // pack                    # packed rows
        y_in = y.reshape(mp, pack * K)        # free contiguous reshape
        # Block-diagonal codebook: blockdiag(A, ..., A) built once (tiny).
        a_in = jnp.kron(jnp.eye(pack, dtype=A.dtype), A)   # (pack*K, pack*H)
        kk, hh = pack * K, pack * H
    else:
        m_pad = _round_up(M, 8)
        if m_pad != M:
            y = jnp.pad(y, ((0, m_pad - M), (0, 0)))
        mp = m_pad
        y_in = y
        a_in = A
        kk, hh = K, H

    # Row-tile size in packed rows: multiple of 8; keep >= 2 grid steps so both
    # v7x TensorCores (each with its own HBM path) get work.
    tm = max(8, _round_up(block_rows // pack, 8))
    tm = min(tm, max(8, _round_up(pl.cdiv(mp, 2), 8)))
    grid = (pl.cdiv(mp, tm),)                 # ragged last block handled by Pallas

    cost = pl.CostEstimate(
        flops=2 * M * K * H,
        transcendentals=0,
        bytes_accessed=(mp * kk * y_in.dtype.itemsize
                        + kk * hh * a_in.dtype.itemsize
                        + mp * hh * jnp.dtype(out_dtype).itemsize),
    )

    out = pl.pallas_call(
        _decoder_matmul_kernel,
        out_shape=jax.ShapeDtypeStruct((mp, hh), out_dtype),
        grid=grid,
        in_specs=[
            pl.BlockSpec((tm, kk), lambda i: (i, 0)),   # streamed row tiles of y
            pl.BlockSpec((kk, hh), lambda i: (0, 0)),   # codebook resident in VMEM
        ],
        out_specs=pl.BlockSpec((tm, hh), lambda i: (i, 0)),
        compiler_params=pltpu.CompilerParams(
            dimension_semantics=("parallel",),          # shard row tiles across TCs
        ),
        cost_estimate=cost,
    )(y_in, a_in)

    out = out.reshape(m_pad, H)               # free un-packing reshape
    if m_pad != M:
        out = out[:M]
    return out


if __name__ == "__main__":
    # Shapes consistent with the module's constructor:
    #   hidden_dim=32, cluster_num=8, code_book_len=4  ->  K = 32
    hidden_dim = 32
    cluster_num = 8
    code_book_len = 4
    K = code_book_len * cluster_num

    key = jax.random.PRNGKey(0)
    k_a, k_y1, k_y2 = jax.random.split(key, 3)

    A = jax.random.normal(k_a, (K, hidden_dim), dtype=jnp.float32)

    # --- Test 1: tiny batch (small-M fast path; exact). ---
    batch_small = 10
    y_small = jax.random.normal(
        k_y1, (batch_small, code_book_len, cluster_num), dtype=jnp.float32)
    ref_small = jnp.matmul(y_small.reshape(-1, K), A)
    out_small = jax.block_until_ready(
        decoder_forward(y_small, A, code_book_len, cluster_num))
    assert out_small.shape == (batch_small, hidden_dim)
    assert jnp.allclose(out_small, ref_small, atol=1e-4, rtol=1e-4)

    # --- Test 2: larger ragged batch, forced through the Pallas kernel
    # (M=5000 is not a multiple of 32: exercises the pad-to-pack and the
    # ragged last grid block; grid has 2 steps). ---
    batch_big = 5000
    y_big = jax.random.normal(
        k_y2, (batch_big, code_book_len, cluster_num), dtype=jnp.float32)
    ref_big = jnp.matmul(y_big.reshape(-1, K), A)
    out_big = jax.block_until_ready(
        decoder_forward(y_big, A, code_book_len, cluster_num,
                        min_pallas_rows=0))
    assert out_big.shape == (batch_big, hidden_dim)
    assert jnp.allclose(out_big, ref_big, atol=1e-4, rtol=1e-4)

    # --- Test 3: tiny batch forced through the Pallas (packed) path for
    # coverage of the pack/unpack reshapes on a ragged tail. ---
    out_small_pallas = jax.block_until_ready(
        decoder_forward(y_small, A, code_book_len, cluster_num,
                        min_pallas_rows=0))
    assert out_small_pallas.shape == (batch_small, hidden_dim)
    assert jnp.allclose(out_small_pallas, ref_small, atol=1e-4, rtol=1e-4)

    print("KERNEL_OK")
</pallas_src>

<mosaic_0001>
module attributes {stable_mosaic.version = 11 : i64} {
  func.func @_decoder_matmul_kernel(%arg0: i32, %arg1: memref<632x128xf32, #tpu.memory_space<vmem>>, %arg2: memref<128x128xf32, #tpu.memory_space<vmem>>, %arg3: memref<632x128xf32, #tpu.memory_space<vmem>>) attributes {dimension_semantics = [#tpu.dimension_semantics<parallel>], iteration_bounds = array<i64: 2>, scalar_prefetch = 0 : i64, scratch_operands = 0 : i64, tpu.core_type = #tpu.core_type<tc>, window_params = [{transform_indices = @transform_0, window_bounds = array<i64: 632, 128>}, {pipeline_mode = #tpu.pipeline_mode<synchronous>, transform_indices = @transform_1, window_bounds = array<i64: 128, 128>}, {transform_indices = @transform_2, window_bounds = array<i64: 632, 128>}]} {
    %c0 = arith.constant 0 : index
    %c0_0 = arith.constant 0 : index
    %0 = vector.load %arg1[%c0, %c0_0] : memref<632x128xf32, #tpu.memory_space<vmem>>, vector<632x128xf32>
    %c0_1 = arith.constant 0 : index
    %c0_2 = arith.constant 0 : index
    %1 = vector.load %arg2[%c0_1, %c0_2] : memref<128x128xf32, #tpu.memory_space<vmem>>, vector<128x128xf32>
    %cst = arith.constant dense<0.000000e+00> : vector<632x128xf32>
    %2 = tpu.matmul %0, %1, %cst {dimension_numbers = #tpu.dot_dimension_numbers<[1], [0], [0], [1], [0, 0, 1, 1], [], []>} : vector<632x128xf32>, vector<128x128xf32>, vector<632x128xf32> -> vector<632x128xf32>
    %c0_3 = arith.constant 0 : index
    %c0_4 = arith.constant 0 : index
    %3 = vector.load %arg3[%c0_3, %c0_4] : memref<632x128xf32, #tpu.memory_space<vmem>>, vector<632x128xf32>
    tpu.vector_store %arg3[%c0_3, %c0_4], %2 {strides = array<i32>} : memref<632x128xf32, #tpu.memory_space<vmem>>, vector<632x128xf32>,
    return
  }
  func.func @transform_0(%arg0: i32) -> (i32, i32) {
    %c0_i32 = arith.constant 0 : i32
    %c0_i32_0 = arith.constant 0 : i32
    return %arg0, %c0_i32 : i32, i32
  }
  func.func @transform_1(%arg0: i32) -> (i32, i32) {
    %c0_i32 = arith.constant 0 : i32
    %c0_i32_0 = arith.constant 0 : i32
    %c0_i32_1 = arith.constant 0 : i32
    return %c0_i32, %c0_i32_0 : i32, i32
  }
  func.func @transform_2(%arg0: i32) -> (i32, i32) {
    %c0_i32 = arith.constant 0 : i32
    %c0_i32_0 = arith.constant 0 : i32
    return %arg0, %c0_i32 : i32, i32
  }
}

</mosaic_0001>

<bundles_post_ra>
// kernel: tpu_custom_call.1
= control target key start
LH: loop header
LB: loop body
LE: loop exit
PB: predicated region body
PF: predicated region fallthrough
CT: control target
= control target key end

     0   :  { %7 = vsyncpa [#allocation3], 0  ;;  %s2104_s0 = inlined_call_operand.hbm [shape: f32[1256,128], index: 0, kind: input, shape index: {}]   ;;  %s2105_s1 = inlined_call_operand.hbm [shape: f32[128,128], index: 1, kind: input, shape index: {}]   ;;  %s2106_s2 = inlined_call_operand.hbm [shape: f32[1256,128], index: 2, kind: output, shape index: {}]  }
   0x1   :  { %9 = vsyncpa [#allocation3 + $0x1], 0 }
   0x2   :  { %10 = vsyncpa [#allocation6], 0 }
   0x3   :  { %11 = vsyncpa [#allocation4], 0 }
   0x4   :  { %13 = vsyncpa [#allocation4 + $0x1], 0  ;;  %s1554_s9 = smov 0   ;;  %s1556_s10 = smov 0  }
   0x5   :  { %s1558_s11 = smov 0   ;;  %s1560_s12 = smov 0  }
   0x6 LB: > { %s1575_s13 = sadd.s32 4294967295, %s1526_s12   ;;  %s930_s14 = sadd.s32 4294967294, %s1526_s12   ;;  %s1526_s12 = sphi %s1560_s12, %s2121_s12   ;;  %s1522_s11 = sphi %s1558_s11, %s2120_s11   ;;  %s1518_s10 = sphi %s1556_s10, %s2119_s10   ;;  %s1514_s9 = sphi %s1554_s9, %s2118_s9  }
   0x7   : > { %s1579_s15 = sadd.s32 1, %s1526_s12   ;;  %s26_s16 = sadd.s32 1, %s1522_s11 }
   0x8   : > { %s23_s17 = ssub.s32 %s1526_s12, %s1579_s15  ;;  %p33_p0 = scmp.ne.s32.totalorder %s1522_s11, %s1518_s10 }
   0x9   : > { %p24_p1 = scmp.eq.s32.totalorder %s23_s17, 0  ;;  %p34_p2 = scmp.eq.s32.totalorder %s1526_s12, 0 }
   0xa   : > { %p39_p3 = scmp.ne.s32.totalorder %s1518_s10, %s1514_s9  ;;  %p40_p4 = scmp.eq.s32.totalorder %s1575_s13, 0 }
   0xb   : > { %s1591_s18 = scalar_select %p24_p1, %s1522_s11, %s26_s16  }
   0xc   : > { %p1593_p5 = por %p34_p2, %p33_p0  ;;  %p1599_p6 = por %p40_p4, %p39_p3 }
   0xd   : > { %p84_p7 = scmp.eq.s32.totalorder %s1575_s13, 1  ;;  %p90_p8 = scmp.eq.s32.totalorder %s930_s14, 1 }
   0xe   : > { %s2110_s20 = scalar_select %p1599_p6, 1, 0 }
   0xf   : > { %p931_p9 = scmp.ge.s32.totalorder %s1526_s12, 1  ;;  %p97_p10 = scmp.lt.s32.totalorder %s1526_s12, 3 }
  0x10   : > { %p1606_p11 = por %p84_p7, %p33_p0  ;;  %p1610_p12 = por %p90_p8, %p39_p3 }
  0x11   : > { %p1614_p13 = pnand %p931_p9, %p97_p10  ;;  %s1528_s24 = smov [#allocation5]  }
  0x12   : > { %s2111_s21 = scalar_select %p1606_p11, 1, 0 }
  0x13   : > { %s2112_s22 = scalar_select %p1610_p12, 1, 0 }
  0x14   : > { %p1354_p1 = pneg %p1614_p13  ;;  %s109_s25 = sshll.u32 %s1528_s24, 4  ;;  %s110_s25 = int_to_ptr.vmem [resolvable:$true] %s109_s25 }
  0x15   : > { %s1417_s26 = scalar_lea.vmem %s110_s25, 2048  ;;  %p1425_p8 = scmp.lt.s32.totalorder %s110_s25, %s110_s25 }
  0x16   : > { %p1355_p2 = pnand %p1354_p1, %p40_p4  ;;  %p1418_p7 = scmp.ne.s32.totalorder %s110_s25, %s1417_s26 }
  0x17   : > { %p1426_p6 = scmp.lt.s32.totalorder %s1417_s26, %s1417_s26 }
  0x18   : > { %p1408_p0 = pneg %p1355_p2 }
  0x19   : > { %p1427_p12 = por %p1426_p6, %p1425_p8 }
  0x1a   : > { %p1420_p11 = pnand %p1418_p7, %p1408_p0 }
  0x1c   : > { %p1421_p3 = pneg %p1420_p11 }
  0x1e   : > { %p1428_p9 = pnand %p1427_p12, %p1421_p3 }
  0x20   : > { %1431 = shalt.err (!%p1428_p9)
}
  0x21   : > { %s1529_s27 = smov 128   ;;  %s1530_s28 = smov 8  }
  0x22   : > { %1357 = dma.hbm_to_vmem [thread:$0]  (!%p1355_p2), %s2105_s1, 2048, %s110_s25, [#allocation6], %s1529_s27, %s1529_s27, %s1530_s28  }
  0x23   : > { %p2108_p10 = scmp.ge.s32.totalorder %s1526_s12, 2 }
  0x25   : > { %119 = sbr.rel (%p2108_p10) target bundleno = 76 (0x4c), region = 20 }
  0x2a   : > { %122 = sbr.rel (!%p1593_p5) target bundleno = 76 (0x4c), region = 24  ;;  %s123_s3 = sand.u32 (%p1593_p5), 1, %s1522_s11  }
  0x2b   : > { %s128_s4 = smul.u32 (%p1593_p5), 79, %s1526_s12  ;;  %s1635_s14 = scalar_lea.sflag (%p1593_p5), [#allocation3], %s123_s3 }
  0x2c   : > { %s1346_s5 = smul.u32 (%p1593_p5), 632, %s123_s3 }
  0x2d   : > { %s129_s6 = ssub.s32 (%p1593_p5), 157, %s128_s4 }
  0x2e   : > { %p130_p6 = scmp.lt.s32.totalorder (%p1593_p5), %s129_s6, 79  ;;  %s127_s16 = scalar_lea.vmem (%p1593_p5), [#allocation2], %s1346_s5 }
  0x30   : > { %s2123_s6 = smov (!%p130_p6, %s129_s6), 79 }
  0x31   : > { %s1632_s7 = sshll.u32 %s2123_s6, 7 }
  0x32   : > { %s134_s8 = ssub.s32 10112, %s1632_s7 }
  0x33   : > { %135 = vsyncadd %s1635_s14, %s134_s8  ;;  %p935_p5 = scmp.ne.s32.totalorder %s1632_s7, 0  ;;  %s948_s17 = smul.u32 10112, %s1526_s12 }
  0x34   : > { %s140_s19 = sshll.u32 %s127_s16, 4  ;;  %s1436_s30 = scalar_lea.hbm %s2104_s0, 20096  ;;  %s1645_s19 = int_to_ptr.vmem [resolvable:$true] %s140_s19 }
  0x35   : > { %s1643_s26 = scalar_lea.hbm %s2104_s0, %s948_s17 }
  0x36   : > { %s1432_s27 = scalar_lea.hbm %s1643_s26, %s1632_s7  ;;  %p1437_p2 = scmp.lt.s32.totalorder %s1643_s26, %s2104_s0 }
  0x37   : > { %p1433_p11 = scmp.ne.s32.totalorder %s1643_s26, %s1432_s27  ;;  %p1438_p0 = scmp.lt.s32.totalorder %s1436_s30, %s1432_s27 }
  0x39   : > { %p1434_p12 = pnand %p1433_p11, %p935_p5  ;;  %p1439_p7 = por %p1438_p0, %p1437_p2 }
  0x3b   : > { %p1435_p1 = pneg %p1434_p12 }
  0x3d   : > { %p1440_p3 = pnand %p1439_p7, %p1435_p1 }
  0x3f   : > { %1443 = shalt.err (!%p1440_p3)
}
  0x40   : > { %s1444_s5 = scalar_lea.vmem %s1645_s19, %s1632_s7  ;;  %s1531_s6 = smov [#allocation2]  }
  0x41   : > { %p1445_p8 = scmp.ne.s32.totalorder %s1645_s19, %s1444_s5  ;;  %s1448_s8 = sshll.u32 %s1531_s6, 4  ;;  %s1449_s8 = int_to_ptr.vmem [resolvable:$false] %s1448_s8 }
  0x42   : > { %s1450_s16 = scalar_lea.vmem %s1449_s8, 20224  ;;  %p1451_p11 = scmp.lt.s32.totalorder %s1645_s19, %s1449_s8 }
  0x43   : > { %p1446_p9 = pnand %p1445_p8, %p935_p5  ;;  %p1452_p12 = scmp.lt.s32.totalorder %s1450_s16, %s1444_s5 }
  0x45   : > { %p1447_p6 = pneg %p1446_p9  ;;  %p1453_p10 = por %p1452_p12, %p1451_p11 }
  0x47   : > { %p1454_p2 = pnand %p1453_p10, %p1447_p6 }
  0x49   : > { %1457 = shalt.err (!%p1454_p2)
}
  0x4a   : > { %s1532_s17 = smov 128   ;;  %s1533_s24 = smov 8  }
  0x4b   : > { %146 = dma.hbm_to_vmem [thread:$0]  (%p935_p5), %s1643_s26, %s1632_s7, %s1645_s19, %s1635_s14, %s1532_s17, %s1532_s17, %s1533_s24  }
  0x4c PF: > { %152 = sbr.rel (%p1614_p13) target bundleno = 496 (0x1f0), region = 28  ;;  %s1674_s25 = sand.u32 (!%p1614_p13), 1, %s1518_s10  }
  0x4d   : > { %s1347_s27 = smul.u32 (!%p1614_p13), 632, %s1674_s25  ;;  %s155_s28 = scalar_lea.sflag (!%p1614_p13), [#allocation3], %s1674_s25 }
  0x4e   : > { %p2114_p10 = scmp.ne.s32.totalorder (!%p1614_p13), %s2110_s20, 0 }
  0x4f   : > { %s1680_s29 = scalar_lea.vmem (!%p1614_p13), [#allocation2], %s1347_s27 }
  0x51   : > { %1501 = dma.done.wait (%p2114_p10), %s155_s28, 10112  }
  0x52   : > { %1503 = vsyncadd (%p2114_p10), %s155_s28, 4294957184 }
  0x53   : > { %1505 = dma.done.wait (%p40_p4), [#allocation6], 2048  }
  0x54   : > { %1507 = vsyncadd (%p40_p4), [#allocation6], 4294965248  ;;  %v1534_v0 = vmov 0.0   ;;  %vm1535_vm0 = vmmov 0   ;;  %v287_v1 = vld [vmem:[#allocation5 + $0x78] sm:$0xff]  ;;  %v286_v2 = vld [vmem:[#allocation5 + $0x70] sm:$0xff] }
  0x55   : > { %1045 = vmatprep.subr.mxu0 %v1534_v0  ;;  %1314 = vmatprep.subr.mxu1 %v1534_v0  ;;  %v285_v3 = vld [vmem:[#allocation5 + $0x68] sm:$0xff]  ;;  %v284_v4 = vld [vmem:[#allocation5 + $0x60] sm:$0xff]  ;;  %v283_v5 = vld [vmem:[#allocation5 + $0x58] sm:$0xff]  ;;  %s1961_s20 = scalar_lea.vmem [#allocation7], %s1347_s27  ;;  %s828_s23 = scalar_lea.sflag [#allocation4], %s1674_s25 }
  0x56   : > { %1077 = vmatprep.mubr.msk.f32.mxu0 %vm1535_vm0, %v1534_v0  ;;  %1197 = vmatprep.mubr.msk.f32.mxu1 %vm1535_vm0, %v1534_v0  ;;  %v282_v6 = vld [vmem:[#allocation5 + $0x50] sm:$0xff]  ;;  %v281_v7 = vld [vmem:[#allocation5 + $0x48] sm:$0xff]  ;;  %v280_v8 = vld [vmem:[#allocation5 + $0x40] sm:$0xff]  ;;  %p2115_p4 = scmp.ne.s32.totalorder %s2111_s21, 0 }
  0x57   : > { %1046 = vmatpush3.msra.mxu0 %v287_v1  ;;  %1330 = vmatpush3.msra.mxu1 %v287_v1  ;;  %v279_v9 = vld [vmem:[#allocation5 + $0x38] sm:$0xff]  ;;  %v278_v10 = vld [vmem:[#allocation5 + $0x30] sm:$0xff]  ;;  %v277_v11 = vld [vmem:[#allocation5 + $0x28] sm:$0xff]  ;;  %s835_s7 = smul.u32 (%p2115_p4), 79, %s1575_s13 }
  0x58   : > { %1047 = vmatprep.subr.mxu0 %v1534_v0  ;;  %1315 = vmatprep.subr.mxu1 %v1534_v0  ;;  %v276_v12 = vld [vmem:[#allocation5 + $0x20] sm:$0xff]  ;;  %v275_v13 = vld [vmem:[#allocation5 + $0x18] sm:$0xff]  ;;  %v274_v14 = vld [vmem:[#allocation5 + $0x10] sm:$0xff] }
  0x59   : > { %1048 = vmatpush3.msra.mxu0 %v286_v2  ;;  %1331 = vmatpush3.msra.mxu1 %v286_v2  ;;  %v273_v15 = vld [vmem:[#allocation5 + $0x8] sm:$0xff]  ;;  %v272_v16 = vld [vmem:[#allocation5] sm:$0xff]  ;;  %v194_v19 = vld [vmem:[%s1680_s29 + $0x8] sm:$0xff]  ;;  %s836_s14 = ssub.s32 (%p2115_p4), 157, %s835_s7 }
  0x5a   : > { %1049 = vmatprep.subr.mxu0 %v1534_v0  ;;  %1316 = vmatprep.subr.mxu1 %v1534_v0  ;;  %v193_v17 = vld [vmem:[%s1680_s29] sm:$0xff]  ;;  %v234_v20 = vld [vmem:[%s1680_s29 + $0x148] sm:$0xff]  ;;  %v195_v21 = vld [vmem:[%s1680_s29 + $0x10] sm:$0xff]  ;;  %p837_p13 = scmp.lt.s32.totalorder (%p2115_p4), %s836_s14, 79 }
  0x5b   : > { %1050 = vmatpush3.msra.mxu0 %v285_v3  ;;  %1332 = vmatpush3.msra.mxu1 %v285_v3  ;;  %v233_v18 = vld [vmem:[%s1680_s29 + $0x140] sm:$0xff]  ;;  %v235_v22 = vld [vmem:[%s1680_s29 + $0x150] sm:$0xff]  ;;  %v196_v23 = vld [vmem:[%s1680_s29 + $0x18] sm:$0xff] }
  0x5c   : > { %1051 = vmatprep.subr.mxu0 %v1534_v0  ;;  %1317 = vmatprep.subr.mxu1 %v1534_v0  ;;  %v236_v24 = vld [vmem:[%s1680_s29 + $0x158] sm:$0xff]  ;;  %v197_v25 = vld [vmem:[%s1680_s29 + $0x20] sm:$0xff]  ;;  %v198_v27 = vld [vmem:[%s1680_s29 + $0x28] sm:$0xff] }
  0x5d   : > { %1052 = vmatpush3.msra.mxu0 %v284_v4  ;;  %1333 = vmatpush3.msra.mxu1 %v284_v4  ;;  %v237_v26 = vld [vmem:[%s1680_s29 + $0x160] sm:$0xff]  ;;  %v238_v28 = vld [vmem:[%s1680_s29 + $0x168] sm:$0xff]  ;;  %v199_v29 = vld [vmem:[%s1680_s29 + $0x30] sm:$0xff] }
  0x5e   : > { %1053 = vmatprep.subr.mxu0 %v1534_v0  ;;  %1318 = vmatprep.subr.mxu1 %v1534_v0  ;;  %v239_v30 = vld [vmem:[%s1680_s29 + $0x170] sm:$0xff]  ;;  %v200_v31 = vld [vmem:[%s1680_s29 + $0x38] sm:$0xff]  ;;  %v201_v33 = vld [vmem:[%s1680_s29 + $0x40] sm:$0xff] }
  0x5f   : > { %1054 = vmatpush3.msra.mxu0 %v283_v5  ;;  %1334 = vmatpush3.msra.mxu1 %v283_v5  ;;  %v240_v32 = vld [vmem:[%s1680_s29 + $0x178] sm:$0xff]  ;;  %v241_v34 = vld [vmem:[%s1680_s29 + $0x180] sm:$0xff]  ;;  %v202_v35 = vld [vmem:[%s1680_s29 + $0x48] sm:$0xff] }
  0x60   : > { %1055 = vmatprep.subr.mxu0 %v1534_v0  ;;  %1319 = vmatprep.subr.mxu1 %v1534_v0  ;;  %v242_v36 = vld [vmem:[%s1680_s29 + $0x188] sm:$0xff]  ;;  %v203_v37 = vld [vmem:[%s1680_s29 + $0x50] sm:$0xff]  ;;  %v204_v39 = vld [vmem:[%s1680_s29 + $0x58] sm:$0xff] }
  0x61   : > { %1056 = vmatpush3.msra.mxu0 %v282_v6  ;;  %1335 = vmatpush3.msra.mxu1 %v282_v6  ;;  %v243_v38 = vld [vmem:[%s1680_s29 + $0x190] sm:$0xff]  ;;  %v244_v40 = vld [vmem:[%s1680_s29 + $0x198] sm:$0xff]  ;;  %v205_v41 = vld [vmem:[%s1680_s29 + $0x60] sm:$0xff] }
  0x62   : > { %1057 = vmatprep.subr.mxu0 %v1534_v0  ;;  %1320 = vmatprep.subr.mxu1 %v1534_v0  ;;  %v245_v42 = vld [vmem:[%s1680_s29 + $0x1a0] sm:$0xff]  ;;  %v206_v43 = vld [vmem:[%s1680_s29 + $0x68] sm:$0xff]  ;;  %v207_v45 = vld [vmem:[%s1680_s29 + $0x70] sm:$0xff] }
  0x63   : > { %1058 = vmatpush3.msra.mxu0 %v281_v7  ;;  %1336 = vmatpush3.msra.mxu1 %v281_v7  ;;  %v246_v44 = vld [vmem:[%s1680_s29 + $0x1a8] sm:$0xff]  ;;  %v247_v46 = vld [vmem:[%s1680_s29 + $0x1b0] sm:$0xff]  ;;  %v208_v47 = vld [vmem:[%s1680_s29 + $0x78] sm:$0xff] }
  0x64   : > { %1059 = vmatprep.subr.mxu0 %v1534_v0  ;;  %1321 = vmatprep.subr.mxu1 %v1534_v0  ;;  %v248_v48 = vld [vmem:[%s1680_s29 + $0x1b8] sm:$0xff]  ;;  %v209_v49 = vld [vmem:[%s1680_s29 + $0x80] sm:$0xff]  ;;  %v210_v51 = vld [vmem:[%s1680_s29 + $0x88] sm:$0xff] }
  0x65   : > { %1060 = vmatpush3.msra.mxu0 %v280_v8  ;;  %1337 = vmatpush3.msra.mxu1 %v280_v8  ;;  %v249_v50 = vld [vmem:[%s1680_s29 + $0x1c0] sm:$0xff]  ;;  %v250_v52 = vld [vmem:[%s1680_s29 + $0x1c8] sm:$0xff]  ;;  %v211_v53 = vld [vmem:[%s1680_s29 + $0x90] sm:$0xff] }
  0x66   : > { %1061 = vmatprep.subr.mxu0 %v1534_v0  ;;  %1322 = vmatprep.subr.mxu1 %v1534_v0  ;;  %v251_v54 = vld [vmem:[%s1680_s29 + $0x1d0] sm:$0xff]  ;;  %v212_v55 = vld [vmem:[%s1680_s29 + $0x98] sm:$0xff]  ;;  %v213_v57 = vld [vmem:[%s1680_s29 + $0xa0] sm:$0xff] }
  0x67   : > { %1062 = vmatpush3.msra.mxu0 %v279_v9  ;;  %1338 = vmatpush3.msra.mxu1 %v279_v9  ;;  %v252_v56 = vld [vmem:[%s1680_s29 + $0x1d8] sm:$0xff]  ;;  %v253_v58 = vld [vmem:[%s1680_s29 + $0x1e0] sm:$0xff]  ;;  %v214_v59 = vld [vmem:[%s1680_s29 + $0xa8] sm:$0xff] }
  0x68   : > { %1063 = vmatprep.subr.mxu0 %v1534_v0  ;;  %1323 = vmatprep.subr.mxu1 %v1534_v0  ;;  %v254_v60 = vld [vmem:[%s1680_s29 + $0x1e8] sm:$0xff]  ;;  %v215_v61 = vld [vmem:[%s1680_s29 + $0xb0] sm:$0xff]  ;;  %v216_v63 = vld [vmem:[%s1680_s29 + $0xb8] sm:$0xff] }
  0x69   : > { %1064 = vmatpush3.msra.mxu0 %v278_v10  ;;  %1339 = vmatpush3.msra.mxu1 %v278_v10  ;;  %v255_v62 = vld [vmem:[%s1680_s29 + $0x1f0] sm:$0xff]  ;;  %v256_v1 = vld [vmem:[%s1680_s29 + $0x1f8] sm:$0xff]  ;;  %v217_v2 = vld [vmem:[%s1680_s29 + $0xc0] sm:$0xff] }
  0x6a   : > { %1065 = vmatprep.subr.mxu0 %v1534_v0  ;;  %1324 = vmatprep.subr.mxu1 %v1534_v0  ;;  %v257_v3 = vld [vmem:[%s1680_s29 + $0x200] sm:$0xff]  ;;  %v218_v4 = vld [vmem:[%s1680_s29 + $0xc8] sm:$0xff]  ;;  %v219_v6 = vld [vmem:[%s1680_s29 + $0xd0] sm:$0xff] }
  0x6b   : > { %1066 = vmatpush3.msra.mxu0 %v277_v11  ;;  %1340 = vmatpush3.msra.mxu1 %v277_v11  ;;  %v258_v5 = vld [vmem:[%s1680_s29 + $0x208] sm:$0xff]  ;;  %v259_v7 = vld [vmem:[%s1680_s29 + $0x210] sm:$0xff]  ;;  %v220_v8 = vld [vmem:[%s1680_s29 + $0xd8] sm:$0xff] }
  0x6c   : > { %1067 = vmatprep.subr.mxu0 %v1534_v0  ;;  %1325 = vmatprep.subr.mxu1 %v1534_v0  ;;  %v260_v9 = vld [vmem:[%s1680_s29 + $0x218] sm:$0xff]  ;;  %v221_v10 = vld [vmem:[%s1680_s29 + $0xe0] sm:$0xff] }
  0x6d   : > { %1068 = vmatpush3.msra.mxu0 %v276_v12  ;;  %1341 = vmatpush3.msra.mxu1 %v276_v12  ;;  %v261_v11 = vld [vmem:[%s1680_s29 + $0x220] sm:$0xff]  ;;  %v222_v12 = vld [vmem:[%s1680_s29 + $0xe8] sm:$0xff] }
  0x6e   : > { %1069 = vmatprep.subr.mxu0 %v1534_v0  ;;  %1326 = vmatprep.subr.mxu1 %v1534_v0 }
  0x6f   : > { %1070 = vmatpush3.msra.mxu0 %v275_v13  ;;  %1342 = vmatpush3.msra.mxu1 %v275_v13  ;;  %v262_v13 = vld [vmem:[%s1680_s29 + $0x228] sm:$0xff] }
  0x70   : > { %1071 = vmatprep.subr.mxu0 %v1534_v0  ;;  %1327 = vmatprep.subr.mxu1 %v1534_v0 }
  0x71   : > { %1072 = vmatpush3.msra.mxu0 %v274_v14  ;;  %1343 = vmatpush3.msra.mxu1 %v274_v14  ;;  %v223_v14 = vld [vmem:[%s1680_s29 + $0xf0] sm:$0xff] }
  0x72   : > { %1073 = vmatprep.subr.mxu0 %v1534_v0  ;;  %1328 = vmatprep.subr.mxu1 %v1534_v0 }
  0x73   : > { %1074 = vmatpush3.msra.mxu0 %v273_v15  ;;  %1344 = vmatpush3.msra.mxu1 %v273_v15  ;;  %v263_v15 = vld [vmem:[%s1680_s29 + $0x230] sm:$0xff] }
  0x74   : > { %1075 = vmatprep.subr.mxu0 %v1534_v0  ;;  %1329 = vmatprep.subr.mxu1 %v1534_v0 }
  0x75   : > { %1076 = vmatpush3.msra.mxu0 %v272_v16  ;;  %1345 = vmatpush3.msra.mxu1 %v272_v16  ;;  %v224_v16 = vld [vmem:[%s1680_s29 + $0xf8] sm:$0xff] }
  0x76   : > { %1078 = vmatmul.mubr.f32.vlgmr.msra.gmra.mxu0 %v193_v17  ;;  %1198 = vmatmul.mubr.f32.vlgmr.msra.gmra.mxu1 %v233_v18  ;;  %v264_v17 = vld [vmem:[%s1680_s29 + $0x238] sm:$0xff]  ;;  %v225_v18 = vld [vmem:[%s1680_s29 + $0x100] sm:$0xff] }
  0x77   : > { %1080 = vmatprep.mubr.msk.f32.mxu0 %vm1535_vm0, %v1534_v0  ;;  %1200 = vmatprep.mubr.msk.f32.mxu1 %vm1535_vm0, %v1534_v0 }
  0x7a   : > { %1081 = vmatmul.mubr.f32.gmra.mxu0 %v194_v19  ;;  %1201 = vmatmul.mubr.f32.gmra.mxu1 %v234_v20  ;;  %v265_v19 = vld [vmem:[%s1680_s29 + $0x240] sm:$0xff]  ;;  %v226_v20 = vld [vmem:[%s1680_s29 + $0x108] sm:$0xff] }
  0x7b   : > { %1083 = vmatprep.mubr.msk.f32.mxu0 %vm1535_vm0, %v1534_v0  ;;  %1203 = vmatprep.mubr.msk.f32.mxu1 %vm1535_vm0, %v1534_v0 }
  0x7e   : > { %1084 = vmatmul.mubr.f32.gmra.mxu0 %v195_v21  ;;  %1204 = vmatmul.mubr.f32.gmra.mxu1 %v235_v22  ;;  %v266_v21 = vld [vmem:[%s1680_s29 + $0x248] sm:$0xff]  ;;  %v227_v22 = vld [vmem:[%s1680_s29 + $0x110] sm:$0xff] }
  0x7f   : > { %1086 = vmatprep.mubr.msk.f32.mxu0 %vm1535_vm0, %v1534_v0  ;;  %1206 = vmatprep.mubr.msk.f32.mxu1 %vm1535_vm0, %v1534_v0 }
  0x82   : > { %1087 = vmatmul.mubr.f32.gmra.mxu0 %v196_v23  ;;  %1207 = vmatmul.mubr.f32.gmra.mxu1 %v236_v24  ;;  %v267_v23 = vld [vmem:[%s1680_s29 + $0x250] sm:$0xff]  ;;  %v228_v24 = vld [vmem:[%s1680_s29 + $0x118] sm:$0xff] }
  0x83   : > { %1089 = vmatprep.mubr.msk.f32.mxu0 %vm1535_vm0, %v1534_v0  ;;  %1209 = vmatprep.mubr.msk.f32.mxu1 %vm1535_vm0, %v1534_v0 }
  0x86   : > { %1090 = vmatmul.mubr.f32.gmra.mxu0 %v197_v25  ;;  %1210 = vmatmul.mubr.f32.gmra.mxu1 %v237_v26  ;;  %v268_v25 = vld [vmem:[%s1680_s29 + $0x258] sm:$0xff]  ;;  %v229_v26 = vld [vmem:[%s1680_s29 + $0x120] sm:$0xff] }
  0x87   : > { %1092 = vmatprep.mubr.msk.f32.mxu0 %vm1535_vm0, %v1534_v0  ;;  %1212 = vmatprep.mubr.msk.f32.mxu1 %vm1535_vm0, %v1534_v0 }
  0x8a   : > { %1093 = vmatmul.mubr.f32.gmra.mxu0 %v198_v27  ;;  %1213 = vmatmul.mubr.f32.gmra.mxu1 %v238_v28  ;;  %v269_v27 = vld [vmem:[%s1680_s29 + $0x260] sm:$0xff]  ;;  %v230_v28 = vld [vmem:[%s1680_s29 + $0x128] sm:$0xff] }
  0x8b   : > { %1095 = vmatprep.mubr.msk.f32.mxu0 %vm1535_vm0, %v1534_v0  ;;  %1215 = vmatprep.mubr.msk.f32.mxu1 %vm1535_vm0, %v1534_v0 }
  0x8e   : > { %1096 = vmatmul.mubr.f32.gmra.mxu0 %v199_v29  ;;  %1216 = vmatmul.mubr.f32.gmra.mxu1 %v239_v30  ;;  %v270_v29 = vld [vmem:[%s1680_s29 + $0x268] sm:$0xff]  ;;  %v231_v30 = vld [vmem:[%s1680_s29 + $0x130] sm:$0xff] }
  0x8f   : > { %1098 = vmatprep.mubr.msk.f32.mxu0 %vm1535_vm0, %v1534_v0  ;;  %1218 = vmatprep.mubr.msk.f32.mxu1 %vm1535_vm0, %v1534_v0 }
  0x92   : > { %1099 = vmatmul.mubr.f32.gmra.mxu0 %v200_v31  ;;  %1219 = vmatmul.mubr.f32.gmra.mxu1 %v240_v32  ;;  %v271_v31 = vld [vmem:[%s1680_s29 + $0x270] sm:$0xff]  ;;  %v232_v32 = vld [vmem:[%s1680_s29 + $0x138] sm:$0xff] }
  0x93   : > { %1101 = vmatprep.mubr.msk.f32.mxu0 %vm1535_vm0, %v1534_v0  ;;  %1221 = vmatprep.mubr.msk.f32.mxu1 %vm1535_vm0, %v1534_v0 }
  0x96   : > { %1102 = vmatmul.mubr.f32.gmra.mxu0 %v201_v33  ;;  %1222 = vmatmul.mubr.f32.gmra.mxu1 %v241_v34 }
  0x97   : > { %1104 = vmatprep.mubr.msk.f32.mxu0 %vm1535_vm0, %v1534_v0  ;;  %1224 = vmatprep.mubr.msk.f32.mxu1 %vm1535_vm0, %v1534_v0 }
  0x9a   : > { %1105 = vmatmul.mubr.f32.gmra.mxu0 %v202_v35  ;;  %1225 = vmatmul.mubr.f32.gmra.mxu1 %v242_v36 }
  0x9b   : > { %1107 = vmatprep.mubr.msk.f32.mxu0 %vm1535_vm0, %v1534_v0  ;;  %1227 = vmatprep.mubr.msk.f32.mxu1 %vm1535_vm0, %v1534_v0 }
  0x9e   : > { %1108 = vmatmul.mubr.f32.gmra.mxu0 %v203_v37  ;;  %1228 = vmatmul.mubr.f32.gmra.mxu1 %v243_v38 }
  0x9f   : > { %1110 = vmatprep.mubr.msk.f32.mxu0 %vm1535_vm0, %v1534_v0  ;;  %1230 = vmatprep.mubr.msk.f32.mxu1 %vm1535_vm0, %v1534_v0 }
  0xa2   : > { %1111 = vmatmul.mubr.f32.gmra.mxu0 %v204_v39  ;;  %1231 = vmatmul.mubr.f32.gmra.mxu1 %v244_v40 }
  0xa3   : > { %1113 = vmatprep.mubr.msk.f32.mxu0 %vm1535_vm0, %v1534_v0  ;;  %1233 = vmatprep.mubr.msk.f32.mxu1 %vm1535_vm0, %v1534_v0 }
  0xa6   : > { %1114 = vmatmul.mubr.f32.gmra.mxu0 %v205_v41  ;;  %1234 = vmatmul.mubr.f32.gmra.mxu1 %v245_v42 }
  0xa7   : > { %1116 = vmatprep.mubr.msk.f32.mxu0 %vm1535_vm0, %v1534_v0  ;;  %1236 = vmatprep.mubr.msk.f32.mxu1 %vm1535_vm0, %v1534_v0 }
  0xaa   : > { %1117 = vmatmul.mubr.f32.gmra.mxu0 %v206_v43  ;;  %1237 = vmatmul.mubr.f32.gmra.mxu1 %v246_v44 }
  0xab   : > { %1119 = vmatprep.mubr.msk.f32.mxu0 %vm1535_vm0, %v1534_v0  ;;  %1239 = vmatprep.mubr.msk.f32.mxu1 %vm1535_vm0, %v1534_v0 }
  0xae   : > { %1120 = vmatmul.mubr.f32.gmra.mxu0 %v207_v45  ;;  %1240 = vmatmul.mubr.f32.gmra.mxu1 %v247_v46 }
  0xaf   : > { %1122 = vmatprep.mubr.msk.f32.mxu0 %vm1535_vm0, %v1534_v0  ;;  %1242 = vmatprep.mubr.msk.f32.mxu1 %vm1535_vm0, %v1534_v0 }
  0xb2   : > { %1123 = vmatmul.mubr.f32.gmra.mxu0 %v208_v47  ;;  %1243 = vmatmul.mubr.f32.gmra.mxu1 %v248_v48 }
  0xb3   : > { %1125 = vmatprep.mubr.msk.f32.mxu0 %vm1535_vm0, %v1534_v0  ;;  %1245 = vmatprep.mubr.msk.f32.mxu1 %vm1535_vm0, %v1534_v0 }
  0xb6   : > { %1126 = vmatmul.mubr.f32.gmra.mxu0 %v209_v49  ;;  %1246 = vmatmul.mubr.f32.gmra.mxu1 %v249_v50 }
  0xb7   : > { %1128 = vmatprep.mubr.msk.f32.mxu0 %vm1535_vm0, %v1534_v0  ;;  %1248 = vmatprep.mubr.msk.f32.mxu1 %vm1535_vm0, %v1534_v0 }
  0xba   : > { %1129 = vmatmul.mubr.f32.gmra.mxu0 %v210_v51  ;;  %1249 = vmatmul.mubr.f32.gmra.mxu1 %v250_v52 }
  0xbb   : > { %1131 = vmatprep.mubr.msk.f32.mxu0 %vm1535_vm0, %v1534_v0  ;;  %1251 = vmatprep.mubr.msk.f32.mxu1 %vm1535_vm0, %v1534_v0 }
  0xbe   : > { %1132 = vmatmul.mubr.f32.gmra.mxu0 %v211_v53  ;;  %1252 = vmatmul.mubr.f32.gmra.mxu1 %v251_v54 }
  0xbf   : > { %1134 = vmatprep.mubr.msk.f32.mxu0 %vm1535_vm0, %v1534_v0  ;;  %1254 = vmatprep.mubr.msk.f32.mxu1 %vm1535_vm0, %v1534_v0 }
  0xc2   : > { %1135 = vmatmul.mubr.f32.gmra.mxu0 %v212_v55  ;;  %1255 = vmatmul.mubr.f32.gmra.mxu1 %v252_v56 }
  0xc3   : > { %1137 = vmatprep.mubr.msk.f32.mxu0 %vm1535_vm0, %v1534_v0  ;;  %1257 = vmatprep.mubr.msk.f32.mxu1 %vm1535_vm0, %v1534_v0 }
  0xc6   : > { %1138 = vmatmul.mubr.f32.gmra.mxu0 %v213_v57  ;;  %1258 = vmatmul.mubr.f32.gmra.mxu1 %v253_v58 }
  0xc7   : > { %1140 = vmatprep.mubr.msk.f32.mxu0 %vm1535_vm0, %v1534_v0  ;;  %1260 = vmatprep.mubr.msk.f32.mxu1 %vm1535_vm0, %v1534_v0 }
  0xca   : > { %1141 = vmatmul.mubr.f32.gmra.mxu0 %v214_v59  ;;  %1261 = vmatmul.mubr.f32.gmra.mxu1 %v254_v60 }
  0xcb   : > { %1143 = vmatprep.mubr.msk.f32.mxu0 %vm1535_vm0, %v1534_v0  ;;  %1263 = vmatprep.mubr.msk.f32.mxu1 %vm1535_vm0, %v1534_v0 }
  0xce   : > { %1144 = vmatmul.mubr.f32.gmra.mxu0 %v215_v61  ;;  %1264 = vmatmul.mubr.f32.gmra.mxu1 %v255_v62 }
  0xcf   : > { %1146 = vmatprep.mubr.msk.f32.mxu0 %vm1535_vm0, %v1534_v0  ;;  %1266 = vmatprep.mubr.msk.f32.mxu1 %vm1535_vm0, %v1534_v0 }
  0xd2   : > { %1147 = vmatmul.mubr.f32.gmra.mxu0 %v216_v63  ;;  %1267 = vmatmul.mubr.f32.gmra.mxu1 %v256_v1 }
  0xd3   : > { %1149 = vmatprep.mubr.msk.f32.mxu0 %vm1535_vm0, %v1534_v0  ;;  %1269 = vmatprep.mubr.msk.f32.mxu1 %vm1535_vm0, %v1534_v0 }
  0xd6   : > { %1150 = vmatmul.mubr.f32.gmra.mxu0 %v217_v2  ;;  %1270 = vmatmul.mubr.f32.gmra.mxu1 %v257_v3 }
  0xd7   : > { %1152 = vmatprep.mubr.msk.f32.mxu0 %vm1535_vm0, %v1534_v0  ;;  %1272 = vmatprep.mubr.msk.f32.mxu1 %vm1535_vm0, %v1534_v0 }
  0xda   : > { %1153 = vmatmul.mubr.f32.gmra.mxu0 %v218_v4  ;;  %1273 = vmatmul.mubr.f32.gmra.mxu1 %v258_v5 }
  0xdb   : > { %1155 = vmatprep.mubr.msk.f32.mxu0 %vm1535_vm0, %v1534_v0  ;;  %1275 = vmatprep.mubr.msk.f32.mxu1 %vm1535_vm0, %v1534_v0 }
  0xde   : > { %1156 = vmatmul.mubr.f32.gmra.mxu0 %v219_v6  ;;  %1276 = vmatmul.mubr.f32.gmra.mxu1 %v259_v7 }
  0xdf   : > { %1158 = vmatprep.mubr.msk.f32.mxu0 %vm1535_vm0, %v1534_v0  ;;  %1278 = vmatprep.mubr.msk.f32.mxu1 %vm1535_vm0, %v1534_v0 }
  0xe2   : > { %1159 = vmatmul.mubr.f32.gmra.mxu0 %v220_v8  ;;  %1279 = vmatmul.mubr.f32.gmra.mxu1 %v260_v9 }
  0xe3   : > { %1161 = vmatprep.mubr.msk.f32.mxu0 %vm1535_vm0, %v1534_v0  ;;  %1281 = vmatprep.mubr.msk.f32.mxu1 %vm1535_vm0, %v1534_v0 }
  0xe6   : > { %1162 = vmatmul.mubr.f32.gmra.mxu0 %v221_v10  ;;  %1282 = vmatmul.mubr.f32.gmra.mxu1 %v261_v11 }
  0xe7   : > { %1164 = vmatprep.mubr.msk.f32.mxu0 %vm1535_vm0, %v1534_v0  ;;  %1284 = vmatprep.mubr.msk.f32.mxu1 %vm1535_vm0, %v1534_v0 }
  0xea   : > { %1165 = vmatmul.mubr.f32.gmra.mxu0 %v222_v12  ;;  %1285 = vmatmul.mubr.f32.gmra.mxu1 %v262_v13 }
  0xeb   : > { %1167 = vmatprep.mubr.msk.f32.mxu0 %vm1535_vm0, %v1534_v0  ;;  %1287 = vmatprep.mubr.msk.f32.mxu1 %vm1535_vm0, %v1534_v0 }
  0xee   : > { %1168 = vmatmul.mubr.f32.gmra.mxu0 %v223_v14  ;;  %1288 = vmatmul.mubr.f32.gmra.mxu1 %v263_v15 }
  0xef   : > { %1170 = vmatprep.mubr.msk.f32.mxu0 %vm1535_vm0, %v1534_v0  ;;  %1290 = vmatprep.mubr.msk.f32.mxu1 %vm1535_vm0, %v1534_v0 }
  0xf2   : > { %1171 = vmatmul.mubr.f32.gmra.mxu0 %v224_v16  ;;  %1291 = vmatmul.mubr.f32.gmra.mxu1 %v264_v17 }
  0xf3   : > { %1173 = vmatprep.mubr.msk.f32.mxu0 %vm1535_vm0, %v1534_v0  ;;  %1293 = vmatprep.mubr.msk.f32.mxu1 %vm1535_vm0, %v1534_v0 }
  0xf6   : > { %1174 = vmatmul.mubr.f32.gmra.mxu0 %v225_v18  ;;  %1294 = vmatmul.mubr.f32.gmra.mxu1 %v265_v19 }
  0xf7   : > { %1176 = vmatprep.mubr.msk.f32.mxu0 %vm1535_vm0, %v1534_v0  ;;  %1296 = vmatprep.mubr.msk.f32.mxu1 %vm1535_vm0, %v1534_v0 }
  0xfa   : > { %1177 = vmatmul.mubr.f32.gmra.mxu0 %v226_v20  ;;  %1297 = vmatmul.mubr.f32.gmra.mxu1 %v266_v21 }
  0xfb   : > { %1179 = vmatprep.mubr.msk.f32.mxu0 %vm1535_vm0, %v1534_v0  ;;  %1299 = vmatprep.mubr.msk.f32.mxu1 %vm1535_vm0, %v1534_v0 }
  0xfe   : > { %1180 = vmatmul.mubr.f32.gmra.mxu0 %v227_v22  ;;  %1300 = vmatmul.mubr.f32.gmra.mxu1 %v267_v23 }
  0xff   : > { %1182 = vmatprep.mubr.msk.f32.mxu0 %vm1535_vm0, %v1534_v0  ;;  %1302 = vmatprep.mubr.msk.f32.mxu1 %vm1535_vm0, %v1534_v0 }
 0x102   : > { %1183 = vmatmul.mubr.f32.gmra.mxu0 %v228_v24  ;;  %1303 = vmatmul.mubr.f32.gmra.mxu1 %v268_v25 }
 0x103   : > { %1185 = vmatprep.mubr.msk.f32.mxu0 %vm1535_vm0, %v1534_v0  ;;  %1305 = vmatprep.mubr.msk.f32.mxu1 %vm1535_vm0, %v1534_v0 }
 0x106   : > { %1186 = vmatmul.mubr.f32.gmra.mxu0 %v229_v26  ;;  %1306 = vmatmul.mubr.f32.gmra.mxu1 %v269_v27 }
 0x107   : > { %1188 = vmatprep.mubr.msk.f32.mxu0 %vm1535_vm0, %v1534_v0  ;;  %1308 = vmatprep.mubr.msk.f32.mxu1 %vm1535_vm0, %v1534_v0 }
 0x10a   : > { %1189 = vmatmul.mubr.f32.gmra.mxu0 %v230_v28  ;;  %1309 = vmatmul.mubr.f32.gmra.mxu1 %v270_v29 }
 0x10b   : > { %1191 = vmatprep.mubr.msk.f32.mxu0 %vm1535_vm0, %v1534_v0  ;;  %1311 = vmatprep.mubr.msk.f32.mxu1 %vm1535_vm0, %v1534_v0 }
 0x10e   : > { %1192 = vmatmul.mubr.f32.gmra.mxu0 %v231_v30  ;;  %1312 = vmatmul.mubr.f32.gmra.mxu1 %v271_v31 }
 0x10f   : > { %1194 = vmatprep.mubr.msk.f32.mxu0 %vm1535_vm0, %v1534_v0 }
 0x112   : > { %1195 = vmatmul.mubr.f32.gmra.mxu0 %v232_v32 }
 0x136   : > { %v354_v33 = vpop.f32.mrf.mxu0  ;;  %v554_v34 = vpop.f32.mrf.mxu1 }
 0x137   : > { %748 = vst [vmem:[%s1961_s20] sm:$0xff] %v354_v33  ;;  %788 = vst [vmem:[%s1961_s20 + $0x140] sm:$0xff] %v554_v34 }
 0x138   : > { %v1079_v35 = vpop.f32.mrf.mxu0  ;;  %v1199_v36 = vpop.f32.mrf.mxu1 }
 0x13a   : > { %v359_v0 = vpop.f32.mrf.mxu0  ;;  %v559_v37 = vpop.f32.mrf.mxu1 }
 0x13b   : > { %749 = vst [vmem:[%s1961_s20 + $0x8] sm:$0xff] %v359_v0  ;;  %789 = vst [vmem:[%s1961_s20 + $0x148] sm:$0xff] %v559_v37 }
 0x13c   : > { %v1082_v38 = vpop.f32.mrf.mxu0  ;;  %v1202_v39 = vpop.f32.mrf.mxu1 }
 0x13e   : > { %v364_v40 = vpop.f32.mrf.mxu0  ;;  %v564_v41 = vpop.f32.mrf.mxu1 }
 0x13f   : > { %750 = vst [vmem:[%s1961_s20 + $0x10] sm:$0xff] %v364_v40  ;;  %790 = vst [vmem:[%s1961_s20 + $0x150] sm:$0xff] %v564_v41 }
 0x140   : > { %v1085_v42 = vpop.f32.mrf.mxu0  ;;  %v1205_v43 = vpop.f32.mrf.mxu1 }
 0x142   : > { %v369_v44 = vpop.f32.mrf.mxu0  ;;  %v569_v45 = vpop.f32.mrf.mxu1 }
 0x143   : > { %751 = vst [vmem:[%s1961_s20 + $0x18] sm:$0xff] %v369_v44  ;;  %791 = vst [vmem:[%s1961_s20 + $0x158] sm:$0xff] %v569_v45 }
 0x144   : > { %v1088_v46 = vpop.f32.mrf.mxu0  ;;  %v1208_v47 = vpop.f32.mrf.mxu1 }
 0x146   : > { %v374_v48 = vpop.f32.mrf.mxu0  ;;  %v574_v49 = vpop.f32.mrf.mxu1 }
 0x147   : > { %752 = vst [vmem:[%s1961_s20 + $0x20] sm:$0xff] %v374_v48  ;;  %792 = vst [vmem:[%s1961_s20 + $0x160] sm:$0xff] %v574_v49 }
 0x148   : > { %v1091_v50 = vpop.f32.mrf.mxu0  ;;  %v1211_v51 = vpop.f32.mrf.mxu1 }
 0x14a   : > { %v379_v52 = vpop.f32.mrf.mxu0  ;;  %v579_v53 = vpop.f32.mrf.mxu1 }
 0x14b   : > { %753 = vst [vmem:[%s1961_s20 + $0x28] sm:$0xff] %v379_v52  ;;  %793 = vst [vmem:[%s1961_s20 + $0x168] sm:$0xff] %v579_v53 }
 0x14c   : > { %v1094_v54 = vpop.f32.mrf.mxu0  ;;  %v1214_v55 = vpop.f32.mrf.mxu1 }
 0x14e   : > { %v384_v56 = vpop.f32.mrf.mxu0  ;;  %v584_v57 = vpop.f32.mrf.mxu1 }
 0x14f   : > { %754 = vst [vmem:[%s1961_s20 + $0x30] sm:$0xff] %v384_v56  ;;  %794 = vst [vmem:[%s1961_s20 + $0x170] sm:$0xff] %v584_v57 }
 0x150   : > { %v1097_v58 = vpop.f32.mrf.mxu0  ;;  %v1217_v59 = vpop.f32.mrf.mxu1 }
 0x152   : > { %v389_v60 = vpop.f32.mrf.mxu0  ;;  %v589_v61 = vpop.f32.mrf.mxu1 }
 0x153   : > { %755 = vst [vmem:[%s1961_s20 + $0x38] sm:$0xff] %v389_v60  ;;  %795 = vst [vmem:[%s1961_s20 + $0x178] sm:$0xff] %v589_v61 }
 0x154   : > { %v1100_v62 = vpop.f32.mrf.mxu0  ;;  %v1220_v63 = vpop.f32.mrf.mxu1 }
 0x156   : > { %v394_v1 = vpop.f32.mrf.mxu0  ;;  %v594_v2 = vpop.f32.mrf.mxu1 }
 0x157   : > { %756 = vst [vmem:[%s1961_s20 + $0x40] sm:$0xff] %v394_v1  ;;  %796 = vst [vmem:[%s1961_s20 + $0x180] sm:$0xff] %v594_v2 }
 0x158   : > { %v1103_v3 = vpop.f32.mrf.mxu0  ;;  %v1223_v4 = vpop.f32.mrf.mxu1 }
 0x15a   : > { %v399_v5 = vpop.f32.mrf.mxu0  ;;  %v599_v6 = vpop.f32.mrf.mxu1 }
 0x15b   : > { %757 = vst [vmem:[%s1961_s20 + $0x48] sm:$0xff] %v399_v5  ;;  %797 = vst [vmem:[%s1961_s20 + $0x188] sm:$0xff] %v599_v6 }
 0x15c   : > { %v1106_v7 = vpop.f32.mrf.mxu0  ;;  %v1226_v8 = vpop.f32.mrf.mxu1 }
 0x15e   : > { %v404_v9 = vpop.f32.mrf.mxu0  ;;  %v604_v10 = vpop.f32.mrf.mxu1 }
 0x15f   : > { %758 = vst [vmem:[%s1961_s20 + $0x50] sm:$0xff] %v404_v9  ;;  %798 = vst [vmem:[%s1961_s20 + $0x190] sm:$0xff] %v604_v10 }
 0x160   : > { %v1109_v11 = vpop.f32.mrf.mxu0  ;;  %v1229_v12 = vpop.f32.mrf.mxu1 }
 0x162   : > { %v409_v13 = vpop.f32.mrf.mxu0  ;;  %v609_v14 = vpop.f32.mrf.mxu1 }
 0x163   : > { %759 = vst [vmem:[%s1961_s20 + $0x58] sm:$0xff] %v409_v13  ;;  %799 = vst [vmem:[%s1961_s20 + $0x198] sm:$0xff] %v609_v14 }
 0x164   : > { %v1112_v15 = vpop.f32.mrf.mxu0  ;;  %v1232_v16 = vpop.f32.mrf.mxu1 }
 0x166   : > { %v414_v17 = vpop.f32.mrf.mxu0  ;;  %v614_v18 = vpop.f32.mrf.mxu1 }
 0x167   : > { %760 = vst [vmem:[%s1961_s20 + $0x60] sm:$0xff] %v414_v17  ;;  %800 = vst [vmem:[%s1961_s20 + $0x1a0] sm:$0xff] %v614_v18 }
 0x168   : > { %v1115_v19 = vpop.f32.mrf.mxu0  ;;  %v1235_v20 = vpop.f32.mrf.mxu1 }
 0x16a   : > { %v419_v21 = vpop.f32.mrf.mxu0  ;;  %v619_v22 = vpop.f32.mrf.mxu1 }
 0x16b   : > { %761 = vst [vmem:[%s1961_s20 + $0x68] sm:$0xff] %v419_v21  ;;  %801 = vst [vmem:[%s1961_s20 + $0x1a8] sm:$0xff] %v619_v22 }
 0x16c   : > { %v1118_v23 = vpop.f32.mrf.mxu0  ;;  %v1238_v24 = vpop.f32.mrf.mxu1 }
 0x16e   : > { %v424_v25 = vpop.f32.mrf.mxu0  ;;  %v624_v26 = vpop.f32.mrf.mxu1 }
 0x16f   : > { %762 = vst [vmem:[%s1961_s20 + $0x70] sm:$0xff] %v424_v25  ;;  %802 = vst [vmem:[%s1961_s20 + $0x1b0] sm:$0xff] %v624_v26 }
 0x170   : > { %v1121_v27 = vpop.f32.mrf.mxu0  ;;  %v1241_v28 = vpop.f32.mrf.mxu1 }
 0x172   : > { %v429_v29 = vpop.f32.mrf.mxu0  ;;  %v629_v30 = vpop.f32.mrf.mxu1 }
 0x173   : > { %763 = vst [vmem:[%s1961_s20 + $0x78] sm:$0xff] %v429_v29  ;;  %803 = vst [vmem:[%s1961_s20 + $0x1b8] sm:$0xff] %v629_v30 }
 0x174   : > { %v1124_v31 = vpop.f32.mrf.mxu0  ;;  %v1244_v32 = vpop.f32.mrf.mxu1 }
 0x176   : > { %v434_v33 = vpop.f32.mrf.mxu0  ;;  %v634_v34 = vpop.f32.mrf.mxu1 }
 0x177   : > { %764 = vst [vmem:[%s1961_s20 + $0x80] sm:$0xff] %v434_v33  ;;  %804 = vst [vmem:[%s1961_s20 + $0x1c0] sm:$0xff] %v634_v34 }
 0x178   : > { %v1127_v35 = vpop.f32.mrf.mxu0  ;;  %v1247_v36 = vpop.f32.mrf.mxu1 }
 0x17a   : > { %v439_v0 = vpop.f32.mrf.mxu0  ;;  %v639_v37 = vpop.f32.mrf.mxu1 }
 0x17b   : > { %765 = vst [vmem:[%s1961_s20 + $0x88] sm:$0xff] %v439_v0  ;;  %805 = vst [vmem:[%s1961_s20 + $0x1c8] sm:$0xff] %v639_v37 }
 0x17c   : > { %v1130_v38 = vpop.f32.mrf.mxu0  ;;  %v1250_v39 = vpop.f32.mrf.mxu1 }
 0x17e   : > { %v444_v40 = vpop.f32.mrf.mxu0  ;;  %v644_v41 = vpop.f32.mrf.mxu1 }
 0x17f   : > { %766 = vst [vmem:[%s1961_s20 + $0x90] sm:$0xff] %v444_v40  ;;  %806 = vst [vmem:[%s1961_s20 + $0x1d0] sm:$0xff] %v644_v41 }
 0x180   : > { %v1133_v42 = vpop.f32.mrf.mxu0  ;;  %v1253_v43 = vpop.f32.mrf.mxu1 }
 0x182   : > { %v449_v44 = vpop.f32.mrf.mxu0  ;;  %v649_v45 = vpop.f32.mrf.mxu1 }
 0x183   : > { %767 = vst [vmem:[%s1961_s20 + $0x98] sm:$0xff] %v449_v44  ;;  %807 = vst [vmem:[%s1961_s20 + $0x1d8] sm:$0xff] %v649_v45 }
 0x184   : > { %v1136_v46 = vpop.f32.mrf.mxu0  ;;  %v1256_v47 = vpop.f32.mrf.mxu1 }
 0x186   : > { %v454_v48 = vpop.f32.mrf.mxu0  ;;  %v654_v49 = vpop.f32.mrf.mxu1 }
 0x187   : > { %768 = vst [vmem:[%s1961_s20 + $0xa0] sm:$0xff] %v454_v48  ;;  %808 = vst [vmem:[%s1961_s20 + $0x1e0] sm:$0xff] %v654_v49 }
 0x188   : > { %v1139_v50 = vpop.f32.mrf.mxu0  ;;  %v1259_v51 = vpop.f32.mrf.mxu1 }
 0x18a   : > { %v459_v52 = vpop.f32.mrf.mxu0  ;;  %v659_v53 = vpop.f32.mrf.mxu1 }
 0x18b   : > { %769 = vst [vmem:[%s1961_s20 + $0xa8] sm:$0xff] %v459_v52  ;;  %809 = vst [vmem:[%s1961_s20 + $0x1e8] sm:$0xff] %v659_v53 }
 0x18c   : > { %v1142_v54 = vpop.f32.mrf.mxu0  ;;  %v1262_v55 = vpop.f32.mrf.mxu1 }
 0x18e   : > { %v464_v56 = vpop.f32.mrf.mxu0  ;;  %v664_v57 = vpop.f32.mrf.mxu1 }
 0x18f   : > { %770 = vst [vmem:[%s1961_s20 + $0xb0] sm:$0xff] %v464_v56  ;;  %810 = vst [vmem:[%s1961_s20 + $0x1f0] sm:$0xff] %v664_v57 }
 0x190   : > { %v1145_v58 = vpop.f32.mrf.mxu0  ;;  %v1265_v59 = vpop.f32.mrf.mxu1 }
 0x192   : > { %v469_v60 = vpop.f32.mrf.mxu0  ;;  %v669_v61 = vpop.f32.mrf.mxu1 }
 0x193   : > { %771 = vst [vmem:[%s1961_s20 + $0xb8] sm:$0xff] %v469_v60  ;;  %811 = vst [vmem:[%s1961_s20 + $0x1f8] sm:$0xff] %v669_v61 }
 0x194   : > { %v1148_v62 = vpop.f32.mrf.mxu0  ;;  %v1268_v63 = vpop.f32.mrf.mxu1 }
 0x196   : > { %v474_v1 = vpop.f32.mrf.mxu0  ;;  %v674_v2 = vpop.f32.mrf.mxu1 }
 0x197   : > { %772 = vst [vmem:[%s1961_s20 + $0xc0] sm:$0xff] %v474_v1  ;;  %812 = vst [vmem:[%s1961_s20 + $0x200] sm:$0xff] %v674_v2 }
 0x198   : > { %v1151_v3 = vpop.f32.mrf.mxu0  ;;  %v1271_v4 = vpop.f32.mrf.mxu1 }
 0x19a   : > { %v479_v5 = vpop.f32.mrf.mxu0  ;;  %v679_v6 = vpop.f32.mrf.mxu1 }
 0x19b   : > { %773 = vst [vmem:[%s1961_s20 + $0xc8] sm:$0xff] %v479_v5  ;;  %813 = vst [vmem:[%s1961_s20 + $0x208] sm:$0xff] %v679_v6 }
 0x19c   : > { %v1154_v7 = vpop.f32.mrf.mxu0  ;;  %v1274_v8 = vpop.f32.mrf.mxu1 }
 0x19e   : > { %v484_v9 = vpop.f32.mrf.mxu0  ;;  %v684_v10 = vpop.f32.mrf.mxu1 }
 0x19f   : > { %774 = vst [vmem:[%s1961_s20 + $0xd0] sm:$0xff] %v484_v9  ;;  %814 = vst [vmem:[%s1961_s20 + $0x210] sm:$0xff] %v684_v10 }
 0x1a0   : > { %v1157_v11 = vpop.f32.mrf.mxu0  ;;  %v1277_v12 = vpop.f32.mrf.mxu1 }
 0x1a2   : > { %v489_v13 = vpop.f32.mrf.mxu0  ;;  %v689_v14 = vpop.f32.mrf.mxu1 }
 0x1a3   : > { %775 = vst [vmem:[%s1961_s20 + $0xd8] sm:$0xff] %v489_v13  ;;  %815 = vst [vmem:[%s1961_s20 + $0x218] sm:$0xff] %v689_v14 }
 0x1a4   : > { %v1160_v15 = vpop.f32.mrf.mxu0  ;;  %v1280_v16 = vpop.f32.mrf.mxu1 }
 0x1a6   : > { %v494_v17 = vpop.f32.mrf.mxu0  ;;  %v694_v18 = vpop.f32.mrf.mxu1 }
 0x1a7   : > { %776 = vst [vmem:[%s1961_s20 + $0xe0] sm:$0xff] %v494_v17  ;;  %816 = vst [vmem:[%s1961_s20 + $0x220] sm:$0xff] %v694_v18 }
 0x1a8   : > { %v1163_v19 = vpop.f32.mrf.mxu0  ;;  %v1283_v20 = vpop.f32.mrf.mxu1 }
 0x1aa   : > { %v499_v21 = vpop.f32.mrf.mxu0  ;;  %v699_v22 = vpop.f32.mrf.mxu1 }
 0x1ab   : > { %777 = vst [vmem:[%s1961_s20 + $0xe8] sm:$0xff] %v499_v21  ;;  %817 = vst [vmem:[%s1961_s20 + $0x228] sm:$0xff] %v699_v22 }
 0x1ac   : > { %v1166_v23 = vpop.f32.mrf.mxu0  ;;  %v1286_v24 = vpop.f32.mrf.mxu1 }
 0x1ae   : > { %v504_v25 = vpop.f32.mrf.mxu0  ;;  %v704_v26 = vpop.f32.mrf.mxu1 }
 0x1af   : > { %778 = vst [vmem:[%s1961_s20 + $0xf0] sm:$0xff] %v504_v25  ;;  %818 = vst [vmem:[%s1961_s20 + $0x230] sm:$0xff] %v704_v26 }
 0x1b0   : > { %v1169_v27 = vpop.f32.mrf.mxu0  ;;  %v1289_v28 = vpop.f32.mrf.mxu1 }
 0x1b2   : > { %v509_v29 = vpop.f32.mrf.mxu0  ;;  %v709_v30 = vpop.f32.mrf.mxu1 }
 0x1b3   : > { %779 = vst [vmem:[%s1961_s20 + $0xf8] sm:$0xff] %v509_v29  ;;  %819 = vst [vmem:[%s1961_s20 + $0x238] sm:$0xff] %v709_v30 }
 0x1b4   : > { %v1172_v31 = vpop.f32.mrf.mxu0  ;;  %v1292_v32 = vpop.f32.mrf.mxu1 }
 0x1b6   : > { %v514_v33 = vpop.f32.mrf.mxu0  ;;  %v714_v34 = vpop.f32.mrf.mxu1 }
 0x1b7   : > { %780 = vst [vmem:[%s1961_s20 + $0x100] sm:$0xff] %v514_v33  ;;  %820 = vst [vmem:[%s1961_s20 + $0x240] sm:$0xff] %v714_v34 }
 0x1b8   : > { %v1175_v35 = vpop.f32.mrf.mxu0  ;;  %v1295_v36 = vpop.f32.mrf.mxu1 }
 0x1ba   : > { %v519_v0 = vpop.f32.mrf.mxu0  ;;  %v719_v37 = vpop.f32.mrf.mxu1 }
 0x1bb   : > { %781 = vst [vmem:[%s1961_s20 + $0x108] sm:$0xff] %v519_v0  ;;  %821 = vst [vmem:[%s1961_s20 + $0x248] sm:$0xff] %v719_v37 }
 0x1bc   : > { %v1178_v38 = vpop.f32.mrf.mxu0  ;;  %v1298_v39 = vpop.f32.mrf.mxu1 }
 0x1be   : > { %v524_v40 = vpop.f32.mrf.mxu0  ;;  %v724_v41 = vpop.f32.mrf.mxu1 }
 0x1bf   : > { %782 = vst [vmem:[%s1961_s20 + $0x110] sm:$0xff] %v524_v40  ;;  %822 = vst [vmem:[%s1961_s20 + $0x250] sm:$0xff] %v724_v41 }
 0x1c0   : > { %v1181_v42 = vpop.f32.mrf.mxu0  ;;  %v1301_v43 = vpop.f32.mrf.mxu1 }
 0x1c2   : > { %v529_v44 = vpop.f32.mrf.mxu0  ;;  %v729_v45 = vpop.f32.mrf.mxu1 }
 0x1c3   : > { %783 = vst [vmem:[%s1961_s20 + $0x118] sm:$0xff] %v529_v44  ;;  %823 = vst [vmem:[%s1961_s20 + $0x258] sm:$0xff] %v729_v45 }
 0x1c4   : > { %v1184_v46 = vpop.f32.mrf.mxu0  ;;  %v1304_v47 = vpop.f32.mrf.mxu1 }
 0x1c6   : > { %v534_v48 = vpop.f32.mrf.mxu0  ;;  %v734_v49 = vpop.f32.mrf.mxu1 }
 0x1c7   : > { %784 = vst [vmem:[%s1961_s20 + $0x120] sm:$0xff] %v534_v48  ;;  %824 = vst [vmem:[%s1961_s20 + $0x260] sm:$0xff] %v734_v49 }
 0x1c8   : > { %v1187_v50 = vpop.f32.mrf.mxu0  ;;  %v1307_v51 = vpop.f32.mrf.mxu1 }
 0x1ca   : > { %v539_v52 = vpop.f32.mrf.mxu0  ;;  %v739_v53 = vpop.f32.mrf.mxu1 }
 0x1cb   : > { %785 = vst [vmem:[%s1961_s20 + $0x128] sm:$0xff] %v539_v52  ;;  %825 = vst [vmem:[%s1961_s20 + $0x268] sm:$0xff] %v739_v53 }
 0x1cc   : > { %v1190_v54 = vpop.f32.mrf.mxu0  ;;  %v1310_v55 = vpop.f32.mrf.mxu1 }
 0x1ce   : > { %v544_v56 = vpop.f32.mrf.mxu0  ;;  %v744_v57 = vpop.f32.mrf.mxu1 }
 0x1cf   : > { %786 = vst [vmem:[%s1961_s20 + $0x130] sm:$0xff] %v544_v56  ;;  %826 = vst [vmem:[%s1961_s20 + $0x270] sm:$0xff] %v744_v57 }
 0x1d0   : > { %v1193_v58 = vpop.f32.mrf.mxu0  ;;  %v1313_v59 = vpop.f32.mrf.mxu1  ;;  %834 = sbr.rel (!%p2115_p4) target bundleno = 496 (0x1f0), region = 40 }
 0x1d2   : > { %v549_v60 = vpop.f32.mrf.mxu0 }
 0x1d3   : > { %787 = vst [vmem:[%s1961_s20 + $0x138] sm:$0xff] %v549_v60 }
 0x1d4   : > { %v1196_v61 = vpop.f32.mrf.mxu0 }
 0x1d5   : > { %s2125_s14 = smov (!%p837_p13, %s836_s14), 79 }
 0x1d6   : > { %s2046_s19 = sshll.u32 %s2125_s14, 7 }
 0x1d7   : > { %s841_s26 = ssub.s32 10112, %s2046_s19 }
 0x1d8   : > { %842 = vsyncadd %s828_s23, %s841_s26  ;;  %p942_p5 = scmp.ne.s32.totalorder %s2046_s19, 0  ;;  %s949_s21 = smul.u32 10112, %s1575_s13 }
 0x1d9   : > { %s847_s30 = sshll.u32 %s1961_s20, 4  ;;  %s1536_s8 = smov [#allocation7]   ;;  %s2059_s30 = int_to_ptr.vmem [resolvable:$true] %s847_s30 }
 0x1da   : > { %s2057_s5 = scalar_lea.hbm %s2106_s2, %s949_s21  ;;  %s1458_s6 = scalar_lea.vmem %s2059_s30, %s2046_s19 }
 0x1db   : > { %p1459_p1 = scmp.ne.s32.totalorder %s2059_s30, %s1458_s6  ;;  %s1462_s16 = sshll.u32 %s1536_s8, 4  ;;  %s1463_s16 = int_to_ptr.vmem [resolvable:$false] %s1462_s16 }
 0x1dc   : > { %s1464_s13 = scalar_lea.vmem %s1463_s16, 20224  ;;  %p1465_p3 = scmp.lt.s32.totalorder %s2059_s30, %s1463_s16 }
 0x1dd   : > { %p1460_p0 = pnand %p1459_p1, %p942_p5  ;;  %p1466_p8 = scmp.lt.s32.totalorder %s1464_s13, %s1458_s6 }
 0x1df   : > { %p1461_p7 = pneg %p1460_p0  ;;  %p1467_p9 = por %p1466_p8, %p1465_p3 }
 0x1e1   : > { %p1468_p6 = pnand %p1467_p9, %p1461_p7 }
 0x1e3   : > { %1471 = shalt.err (!%p1468_p6)
}
 0x1e4   : > { %s1472_s17 = scalar_lea.hbm %s2057_s5, %s2046_s19  ;;  %s1476_s28 = scalar_lea.hbm %s2106_s2, 20096 }
 0x1e5   : > { %p1473_p11 = scmp.ne.s32.totalorder %s2057_s5, %s1472_s17  ;;  %p1477_p10 = scmp.lt.s32.totalorder %s2057_s5, %s2106_s2 }
 0x1e6   : > { %p1478_p4 = scmp.lt.s32.totalorder %s1476_s28, %s1472_s17 }
 0x1e7   : > { %p1474_p12 = pnand %p1473_p11, %p942_p5 }
 0x1e8   : > { %p1479_p13 = por %p1478_p4, %p1477_p10 }
 0x1e9   : > { %p1475_p2 = pneg %p1474_p12 }
 0x1eb   : > { %p1480_p1 = pnand %p1479_p13, %p1475_p2 }
 0x1ed   : > { %1483 = shalt.err (!%p1480_p1)
}
 0x1ee   : > { %s1537_s7 = smov 128   ;;  %s1538_s14 = smov 8  }
 0x1ef   : > { %853 = dma.vmem_to_hbm [thread:$0]  (%p942_p5), %s2059_s30, %s2046_s19, %s2057_s5, %s828_s23, %s1537_s7, %s1537_s7, %s1538_s14  }
 0x1f0 PF: > { %s862_s26 = sand.u32 1, %s1514_s9   ;;  %p2116_p0 = scmp.ne.s32.totalorder %s2112_s22, 0 }
 0x1f1   : > { %p2117_p7 = scmp.ge.s32.totalorder %s1526_s12, 2  ;;  %s863_s21 = scalar_lea.sflag [#allocation4], %s862_s26 }
 0x1f3   : > { %p1359_p3 = pnand %p2117_p7, %p2116_p0 }
 0x1f5   : > { %p1360_p8 = pneg %p1359_p3 }
 0x1f7   : > { %1509 = dma.done.wait (%p1360_p8), %s863_s21, 10112  }
 0x1f8   : > { %1511 = vsyncadd (%p1360_p8), %s863_s21, 4294957184  ;;  %p16_p9 = scmp.ge.s32.totalorder %s1579_s15, 4   ;;  %s2118_s9 = smov %s1518_s10 }
 0x1f9   : > { %s2119_s10 = smov %s1522_s11  ;;  %s2120_s11 = smov %s1591_s18 }
 0x1fa   : > { %s2121_s12 = smov %s1579_s15  ;;  %18 = sbr.rel (!%p16_p9) target bundleno = 6 (0x6), region = 77 }
 0x1ff   :  { %868 = vsyncpa [#allocation3], 1 }
 0x200   :  { %870 = vsyncpa [#allocation3 + $0x1], 1 }
 0x201   :  { %871 = vsyncpa [#allocation6], 1 }
 0x202   :  { %872 = vsyncpa [#allocation4], 1 }
 0x203   :  { %874 = vsyncpa [#allocation4 + $0x1], 1 }

</bundles_post_ra>
